<compile_context>
chip_gen: v7x
topology: tpu7x:2x2x1
jax: 0.10.0
libtpu: 0.0.40
codegen_flags: <defaults>
</compile_context>

<pallas_src>
import functools

import jax
import jax.numpy as jnp
from jax import lax
from jax.experimental import pallas as pl
from jax.experimental.pallas import tpu as pltpu

LANE = 128


def _round_up(n, m):
    return ((n + m - 1) // m) * m


def _act(h, act_type):
    if act_type == "relu":
        return jnp.maximum(h, 0.0)
    if act_type == "lk_relu":
        # torch.nn.LeakyReLU default negative_slope = 0.01
        return jnp.where(h >= 0.0, h, 0.01 * h)
    return h


def mlp_kernel(x_ref,
               w1_ref, b1_ref,
               w2_ref, b2_ref,
               w3_ref, b3_ref,
               wot_ref, bot_ref,
               ot_ref,
               *, act_type):
    # x tile arrives f32; cast to bf16 on the VPU (VALU has slack) so the MXU
    # runs bf16 inputs with f32 accumulation. Bias add + activation in f32.
    h = x_ref[...].astype(jnp.bfloat16)
    for w_ref, b_ref in ((w1_ref, b1_ref), (w2_ref, b2_ref), (w3_ref, b3_ref)):
        z = jnp.dot(h, w_ref[...], preferred_element_type=jnp.float32) + b_ref[...]
        h = _act(z, act_type).astype(jnp.bfloat16)
    # layer_out, computed transposed:  out^T = W_o^T @ h^T.
    # dot_general contracts the feature axis of both operands (the MXU handles
    # the transposed RHS natively); result (out_pad8, tb) has batch on the
    # lane axis -> unmasked, fully lane-dense stores with no 128-wide padding.
    zt = lax.dot_general(wot_ref[...], h,
                         dimension_numbers=(((1,), (1,)), ((), ())),
                         preferred_element_type=jnp.float32)
    ot_ref[...] = zt + bot_ref[...]


def make_params(key, input_dim, output_dim, n_layers=3):
    """Deterministic init mirroring the shapes of ModelNN.__init__.

    torch Linear(in, out) has weight (out, in); we store (in, out) so the
    kernel can do  x @ W  directly.
    """
    dims = [input_dim // n for n in range(1, n_layers + 2)]  # D0..D3
    params = []
    for i in range(n_layers):
        key, kw, kb = jax.random.split(key, 3)
        fan_in = dims[i]
        bound = 1.0 / (fan_in ** 0.5)
        w = jax.random.uniform(kw, (dims[i], dims[i + 1]),
                               minval=-bound, maxval=bound, dtype=jnp.float32)
        b = jax.random.uniform(kb, (1, dims[i + 1]),
                               minval=-bound, maxval=bound, dtype=jnp.float32)
        params.append((w, b))
    key, kw, kb = jax.random.split(key, 3)
    fan_in = dims[-1]
    bound = 1.0 / (fan_in ** 0.5)
    wo = jax.random.uniform(kw, (dims[-1], output_dim),
                            minval=-bound, maxval=bound, dtype=jnp.float32)
    bo = jax.random.uniform(kb, (1, output_dim),
                            minval=-bound, maxval=bound, dtype=jnp.float32)
    params.append((wo, bo))
    return params


def prepare_params(params):
    """One-time param prep (hoisted out of the per-call wrapper):
    bf16-cast hidden weights, transpose + sublane-pad the output layer."""
    (w1, b1), (w2, b2), (w3, b3), (wo, bo) = params
    out_dim = wo.shape[1]
    out_pad = _round_up(out_dim, 8)          # f32 sublane quantum
    wot = jnp.zeros((out_pad, wo.shape[0]), jnp.float32).at[:out_dim, :].set(wo.T)
    bot = jnp.zeros((out_pad, 1), jnp.float32).at[:out_dim, :].set(bo.T)
    prepped = {
        "w1": w1.astype(jnp.bfloat16), "b1": b1,
        "w2": w2.astype(jnp.bfloat16), "b2": b2,
        "w3": w3.astype(jnp.bfloat16), "b3": b3,
        "wot": wot.astype(jnp.bfloat16), "bot": bot,
        "out_dim": out_dim,
    }
    return jax.tree_util.tree_map(
        lambda a: a if isinstance(a, int) else jax.block_until_ready(a), prepped)


def model_nn_forward(x, prepped, act_type=None, *, block_b=512):
    """Fused MLP forward. Batched over a grid of lane-multiple row tiles."""
    B, D0 = x.shape
    out_dim = prepped["out_dim"]
    out_pad = prepped["wot"].shape[0]

    # --- batch tiling: tiles are multiples of 128 (lane-dense transposed
    # output); keep >= 2 grid steps when B >= 256 so v7x megacore is used ----
    b_pad = _round_up(B, LANE)
    tb = min(block_b, _round_up(pl.cdiv(b_pad, 2), LANE))
    tb = max(LANE, min(tb, b_pad))
    b_pad = _round_up(B, tb)
    assert tb % LANE == 0 and b_pad % tb == 0
    x_p = x if b_pad == B else jnp.pad(x, ((0, b_pad - B), (0, 0)))

    def resident(arr):
        # constant block index -> DMA'd once, VMEM-resident across grid steps
        return pl.BlockSpec(arr.shape, lambda i: (0, 0))

    kernel = functools.partial(mlp_kernel, act_type=act_type)
    out_t = pl.pallas_call(
        kernel,
        out_shape=jax.ShapeDtypeStruct((out_pad, b_pad), jnp.float32),
        grid_spec=pltpu.PrefetchScalarGridSpec(
            num_scalar_prefetch=0,
            grid=(b_pad // tb,),
            in_specs=[
                pl.BlockSpec((tb, D0), lambda i: (i, 0)),   # x: streamed tiles
                resident(prepped["w1"]), resident(prepped["b1"]),
                resident(prepped["w2"]), resident(prepped["b2"]),
                resident(prepped["w3"]), resident(prepped["b3"]),
                resident(prepped["wot"]), resident(prepped["bot"]),
            ],
            out_specs=pl.BlockSpec((out_pad, tb), lambda i: (0, i)),
        ),
        compiler_params=pltpu.CompilerParams(
            dimension_semantics=("parallel",),   # megacore split on v7x
        ),
    )(x_p,
      prepped["w1"], prepped["b1"],
      prepped["w2"], prepped["b2"],
      prepped["w3"], prepped["b3"],
      prepped["wot"], prepped["bot"])

    # tiny (out_dim, B) slab -> slice + transpose back in the wrapper
    return out_t[:out_dim, :B].T


def model_nn_reference(x, params, act_type=None, *, match_kernel_dtypes=True):
    """Pure-JAX reference. With match_kernel_dtypes=True it mirrors the
    kernel's bf16-input / f32-accumulate dtype policy for a tight check."""
    (w1, b1), (w2, b2), (w3, b3), (wo, bo) = params
    cast = (lambda a: a.astype(jnp.bfloat16)) if match_kernel_dtypes else (lambda a: a)
    h = cast(x)
    for w, b in ((w1, b1), (w2, b2), (w3, b3)):
        z = jnp.dot(h, cast(w), preferred_element_type=jnp.float32) + b
        h = cast(_act(z, act_type))
    return jnp.dot(h, cast(wo), preferred_element_type=jnp.float32) + bo


if __name__ == "__main__":
    input_dim = 48    # 48 // 1 = 48, // 2 = 24, // 3 = 16, // 4 = 12
    output_dim = 8
    batch = 512       # exercises the batch grid (2 parallel tiles of 256)
    act_type = "relu"

    key = jax.random.PRNGKey(0)
    kx, kp = jax.random.split(key)
    x = jax.random.normal(kx, (batch, input_dim), dtype=jnp.float32)
    params = make_params(kp, input_dim, output_dim, n_layers=3)
    prepped = prepare_params(params)   # one-time prep, reused across calls

    out = model_nn_forward(x, prepped, act_type=act_type, block_b=512)
    out = jax.block_until_ready(out)

    ref_bf = model_nn_reference(x, params, act_type=act_type,
                                match_kernel_dtypes=True)
    ref_f32 = model_nn_reference(x, params, act_type=act_type,
                                 match_kernel_dtypes=False)
    assert out.shape == (batch, output_dim)
    # tight check vs. a dtype-matched reference ...
    assert jnp.allclose(out, ref_bf, atol=1e-3, rtol=1e-3)
    # ... and a looser sanity check vs. the full-f32 reference (bf16 weights)
    assert jnp.allclose(out, ref_f32, atol=5e-2, rtol=5e-2)

    print("KERNEL_OK")
</pallas_src>

<mosaic_0001>
module attributes {stable_mosaic.version = 11 : i64} {
  func.func @mlp_kernel(%arg0: i32, %arg1: memref<256x48xf32, #tpu.memory_space<vmem>>, %arg2: memref<48x24xbf16, #tpu.memory_space<vmem>>, %arg3: memref<1x24xf32, #tpu.memory_space<vmem>>, %arg4: memref<24x16xbf16, #tpu.memory_space<vmem>>, %arg5: memref<1x16xf32, #tpu.memory_space<vmem>>, %arg6: memref<16x12xbf16, #tpu.memory_space<vmem>>, %arg7: memref<1x12xf32, #tpu.memory_space<vmem>>, %arg8: memref<8x12xbf16, #tpu.memory_space<vmem>>, %arg9: memref<8x1xf32, #tpu.memory_space<vmem>>, %arg10: memref<8x256xf32, #tpu.memory_space<vmem>>) attributes {dimension_semantics = [#tpu.dimension_semantics<parallel>], iteration_bounds = array<i64: 2>, scalar_prefetch = 0 : i64, scratch_operands = 0 : i64, tpu.core_type = #tpu.core_type<tc>, window_params = [{transform_indices = @transform_0, window_bounds = array<i64: 256, 48>}, {pipeline_mode = #tpu.pipeline_mode<synchronous>, transform_indices = @transform_1, window_bounds = array<i64: 48, 24>}, {pipeline_mode = #tpu.pipeline_mode<synchronous>, transform_indices = @transform_2, window_bounds = array<i64: 1, 24>}, {pipeline_mode = #tpu.pipeline_mode<synchronous>, transform_indices = @transform_3, window_bounds = array<i64: 24, 16>}, {pipeline_mode = #tpu.pipeline_mode<synchronous>, transform_indices = @transform_4, window_bounds = array<i64: 1, 16>}, {pipeline_mode = #tpu.pipeline_mode<synchronous>, transform_indices = @transform_5, window_bounds = array<i64: 16, 12>}, {pipeline_mode = #tpu.pipeline_mode<synchronous>, transform_indices = @transform_6, window_bounds = array<i64: 1, 12>}, {pipeline_mode = #tpu.pipeline_mode<synchronous>, transform_indices = @transform_7, window_bounds = array<i64: 8, 12>}, {pipeline_mode = #tpu.pipeline_mode<synchronous>, transform_indices = @transform_8, window_bounds = array<i64: 8, 1>}, {transform_indices = @transform_9, window_bounds = array<i64: 8, 256>}]} {
    %c0 = arith.constant 0 : index
    %c0_0 = arith.constant 0 : index
    %0 = vector.load %arg1[%c0, %c0_0] : memref<256x48xf32, #tpu.memory_space<vmem>>, vector<256x48xf32>
    %1 = arith.truncf %0 : vector<256x48xf32> to vector<256x48xbf16>
    %c0_1 = arith.constant 0 : index
    %c0_2 = arith.constant 0 : index
    %2 = vector.load %arg2[%c0_1, %c0_2] : memref<48x24xbf16, #tpu.memory_space<vmem>>, vector<48x24xbf16>
    %cst = arith.constant dense<0.000000e+00> : vector<256x24xf32>
    %3 = tpu.matmul %1, %2, %cst {dimension_numbers = #tpu.dot_dimension_numbers<[1], [0], [0], [1], [0, 0, 1, 1], [], []>} : vector<256x48xbf16>, vector<48x24xbf16>, vector<256x24xf32> -> vector<256x24xf32>
    %c0_3 = arith.constant 0 : index
    %c0_4 = arith.constant 0 : index
    %4 = vector.load %arg3[%c0_3, %c0_4] : memref<1x24xf32, #tpu.memory_space<vmem>>, vector<1x24xf32>
    %5 = vector.broadcast %4 : vector<1x24xf32> to vector<256x24xf32>
    %6 = arith.addf %3, %5 : vector<256x24xf32>
    %cst_5 = arith.constant 0.000000e+00 : f32
    %7 = vector.broadcast %cst_5 : f32 to vector<256x24xf32>
    %8 = arith.maximumf %6, %7 : vector<256x24xf32>
    %9 = arith.truncf %8 : vector<256x24xf32> to vector<256x24xbf16>
    %c0_6 = arith.constant 0 : index
    %c0_7 = arith.constant 0 : index
    %10 = vector.load %arg4[%c0_6, %c0_7] : memref<24x16xbf16, #tpu.memory_space<vmem>>, vector<24x16xbf16>
    %cst_8 = arith.constant dense<0.000000e+00> : vector<256x16xf32>
    %11 = tpu.matmul %9, %10, %cst_8 {dimension_numbers = #tpu.dot_dimension_numbers<[1], [0], [0], [1], [0, 0, 1, 1], [], []>} : vector<256x24xbf16>, vector<24x16xbf16>, vector<256x16xf32> -> vector<256x16xf32>
    %c0_9 = arith.constant 0 : index
    %c0_10 = arith.constant 0 : index
    %12 = vector.load %arg5[%c0_9, %c0_10] : memref<1x16xf32, #tpu.memory_space<vmem>>, vector<1x16xf32>
    %13 = vector.broadcast %12 : vector<1x16xf32> to vector<256x16xf32>
    %14 = arith.addf %11, %13 : vector<256x16xf32>
    %cst_11 = arith.constant 0.000000e+00 : f32
    %15 = vector.broadcast %cst_11 : f32 to vector<256x16xf32>
    %16 = arith.maximumf %14, %15 : vector<256x16xf32>
    %17 = arith.truncf %16 : vector<256x16xf32> to vector<256x16xbf16>
    %c0_12 = arith.constant 0 : index
    %c0_13 = arith.constant 0 : index
    %18 = vector.load %arg6[%c0_12, %c0_13] : memref<16x12xbf16, #tpu.memory_space<vmem>>, vector<16x12xbf16>
    %cst_14 = arith.constant dense<0.000000e+00> : vector<256x12xf32>
    %19 = tpu.matmul %17, %18, %cst_14 {dimension_numbers = #tpu.dot_dimension_numbers<[1], [0], [0], [1], [0, 0, 1, 1], [], []>} : vector<256x16xbf16>, vector<16x12xbf16>, vector<256x12xf32> -> vector<256x12xf32>
    %c0_15 = arith.constant 0 : index
    %c0_16 = arith.constant 0 : index
    %20 = vector.load %arg7[%c0_15, %c0_16] : memref<1x12xf32, #tpu.memory_space<vmem>>, vector<1x12xf32>
    %21 = vector.broadcast %20 : vector<1x12xf32> to vector<256x12xf32>
    %22 = arith.addf %19, %21 : vector<256x12xf32>
    %cst_17 = arith.constant 0.000000e+00 : f32
    %23 = vector.broadcast %cst_17 : f32 to vector<256x12xf32>
    %24 = arith.maximumf %22, %23 : vector<256x12xf32>
    %25 = arith.truncf %24 : vector<256x12xf32> to vector<256x12xbf16>
    %c0_18 = arith.constant 0 : index
    %c0_19 = arith.constant 0 : index
    %26 = vector.load %arg8[%c0_18, %c0_19] : memref<8x12xbf16, #tpu.memory_space<vmem>>, vector<8x12xbf16>
    %cst_20 = arith.constant dense<0.000000e+00> : vector<8x256xf32>
    %27 = tpu.matmul %26, %25, %cst_20 {dimension_numbers = #tpu.dot_dimension_numbers<[1], [1], [0], [0], [0, 0, 1, 0], [], []>} : vector<8x12xbf16>, vector<256x12xbf16>, vector<8x256xf32> -> vector<8x256xf32>
    %c0_21 = arith.constant 0 : index
    %c0_22 = arith.constant 0 : index
    %28 = vector.load %arg9[%c0_21, %c0_22] : memref<8x1xf32, #tpu.memory_space<vmem>>, vector<8x1xf32>
    %29 = vector.broadcast %28 : vector<8x1xf32> to vector<8x256xf32>
    %30 = arith.addf %27, %29 : vector<8x256xf32>
    %c0_23 = arith.constant 0 : index
    %c0_24 = arith.constant 0 : index
    %31 = vector.load %arg10[%c0_23, %c0_24] : memref<8x256xf32, #tpu.memory_space<vmem>>, vector<8x256xf32>
    tpu.vector_store %arg10[%c0_23, %c0_24], %30 {strides = array<i32>} : memref<8x256xf32, #tpu.memory_space<vmem>>, vector<8x256xf32>,
    return
  }
  func.func @transform_0(%arg0: i32) -> (i32, i32) {
    %c0_i32 = arith.constant 0 : i32
    %c0_i32_0 = arith.constant 0 : i32
    return %arg0, %c0_i32 : i32, i32
  }
  func.func @transform_1(%arg0: i32) -> (i32, i32) {
    %c0_i32 = arith.constant 0 : i32
    %c0_i32_0 = arith.constant 0 : i32
    %c0_i32_1 = arith.constant 0 : i32
    return %c0_i32, %c0_i32_0 : i32, i32
  }
  func.func @transform_2(%arg0: i32) -> (i32, i32) {
    %c0_i32 = arith.constant 0 : i32
    %c0_i32_0 = arith.constant 0 : i32
    %c0_i32_1 = arith.constant 0 : i32
    return %c0_i32, %c0_i32_0 : i32, i32
  }
  func.func @transform_3(%arg0: i32) -> (i32, i32) {
    %c0_i32 = arith.constant 0 : i32
    %c0_i32_0 = arith.constant 0 : i32
    %c0_i32_1 = arith.constant 0 : i32
    return %c0_i32, %c0_i32_0 : i32, i32
  }
  func.func @transform_4(%arg0: i32) -> (i32, i32) {
    %c0_i32 = arith.constant 0 : i32
    %c0_i32_0 = arith.constant 0 : i32
    %c0_i32_1 = arith.constant 0 : i32
    return %c0_i32, %c0_i32_0 : i32, i32
  }
  func.func @transform_5(%arg0: i32) -> (i32, i32) {
    %c0_i32 = arith.constant 0 : i32
    %c0_i32_0 = arith.constant 0 : i32
    %c0_i32_1 = arith.constant 0 : i32
    return %c0_i32, %c0_i32_0 : i32, i32
  }
  func.func @transform_6(%arg0: i32) -> (i32, i32) {
    %c0_i32 = arith.constant 0 : i32
    %c0_i32_0 = arith.constant 0 : i32
    %c0_i32_1 = arith.constant 0 : i32
    return %c0_i32, %c0_i32_0 : i32, i32
  }
  func.func @transform_7(%arg0: i32) -> (i32, i32) {
    %c0_i32 = arith.constant 0 : i32
    %c0_i32_0 = arith.constant 0 : i32
    %c0_i32_1 = arith.constant 0 : i32
    return %c0_i32, %c0_i32_0 : i32, i32
  }
  func.func @transform_8(%arg0: i32) -> (i32, i32) {
    %c0_i32 = arith.constant 0 : i32
    %c0_i32_0 = arith.constant 0 : i32
    %c0_i32_1 = arith.constant 0 : i32
    return %c0_i32, %c0_i32_0 : i32, i32
  }
  func.func @transform_9(%arg0: i32) -> (i32, i32) {
    %c0_i32 = arith.constant 0 : i32
    %c0_i32_0 = arith.constant 0 : i32
    return %c0_i32, %arg0 : i32, i32
  }
}

</mosaic_0001>

<bundles_post_ra>
// kernel: tpu_custom_call.1
= control target key start
LH: loop header
LB: loop body
LE: loop exit
PB: predicated region body
PF: predicated region fallthrough
CT: control target
= control target key end

     0   :  { %14 = vsyncpa [#allocation3], 0  ;;  %s2187_s0 = inlined_call_operand.vmem [shape: f32[512,48], index: 0, kind: input, shape index: {}]   ;;  %s2188_s1 = inlined_call_operand.vmem [shape: bf16[48,24], index: 1, kind: input, shape index: {}]   ;;  %s2189_s2 = inlined_call_operand.vmem [shape: f32[1,24], index: 2, kind: input, shape index: {}]   ;;  %s2190_s3 = inlined_call_operand.vmem [shape: bf16[24,16], index: 3, kind: input, shape index: {}]   ;;  %s2191_s4 = inlined_call_operand.vmem [shape: f32[1,16], index: 4, kind: input, shape index: {}]   ;;  %s2192_s5 = inlined_call_operand.vmem [shape: bf16[16,12], index: 5, kind: input, shape index: {}]   ;;  %s2193_s6 = inlined_call_operand.vmem [shape: f32[1,12], index: 6, kind: input, shape index: {}]   ;;  %s2194_s7 = inlined_call_operand.vmem [shape: bf16[8,12], index: 7, kind: input, shape index: {}]   ;;  %s2195_s8 = inlined_call_operand.vmem [shape: f32[8,1], index: 8, kind: input, shape index: {}]   ;;  %s2196_s9 = inlined_call_operand.hbm [shape: f32[8,512], index: 9, kind: output, shape index: {}]  }
   0x1   :  { %16 = vsyncpa [#allocation3 + $0x1], 0  ;;  %s1825_s30 = smov 0   ;;  %s1827_s10 = smov 0  }
   0x2   :  { %s1829_s11 = smov 0   ;;  %s1831_s12 = smov 0  }
   0x3 LB: > { %s1846_s13 = sadd.s32 4294967295, %s1771_s12   ;;  %s1402_s14 = sadd.s32 4294967294, %s1771_s12   ;;  %s1771_s12 = sphi %s1831_s12, %s2202_s12   ;;  %s1767_s11 = sphi %s1829_s11, %s2201_s11   ;;  %s1763_s10 = sphi %s1827_s10, %s2200_s10   ;;  %s1759_s30 = sphi %s1825_s30, %s2199_s30  }
   0x4   : > { %s1850_s15 = sadd.s32 1, %s1771_s12   ;;  %s223_s16 = sadd.s32 1, %s1767_s11 }
   0x5   : > { %s220_s17 = ssub.s32 %s1771_s12, %s1850_s15  ;;  %p233_p0 = scmp.ne.s32.totalorder %s1767_s11, %s1763_s10 }
   0x6   : > { %p221_p1 = scmp.eq.s32.totalorder %s220_s17, 0  ;;  %p234_p2 = scmp.eq.s32.totalorder %s1846_s13, 1 }
   0x7   : > { %p239_p3 = scmp.ne.s32.totalorder %s1763_s10, %s1759_s30  ;;  %p240_p4 = scmp.eq.s32.totalorder %s1402_s14, 1 }
   0x8   : > { %s1861_s18 = scalar_select %p221_p1, %s1767_s11, %s223_s16  }
   0x9   : > { %p1863_p5 = por %p234_p2, %p233_p0  ;;  %p1867_p6 = por %p240_p4, %p239_p3 }
   0xa   : > { %p1405_p7 = scmp.ge.s32.totalorder %s1771_s12, 1  ;;  %p291_p8 = scmp.lt.s32.totalorder %s1771_s12, 3 }
   0xc   : > { %p292_p9 = pnand %p1405_p7, %p291_p8 }
   0xd   : > { %v1703_v0 = vld [vmem:[%s2188_s1] sm:$0xff] (!%p292_p9)   ;;  %s1407_s23 = sshll.u32 (!%p292_p9), %s1846_s13, 5  ;;  %v1704_v1 = vld [vmem:[%s2188_s1 + $0x8] sm:$0xff] (!%p292_p9)   ;;  %v1705_v2 = vld [vmem:[%s2188_s1 + $0x10] sm:$0xff] (!%p292_p9)   ;;  %vm414_vm0 = vcmask (!%p292_p9), 392192   ;;  %vm740_vm1 = vcmask (!%p292_p9), 1043456  }
   0xe   : > { %295 = sbr.rel (%p292_p9) target bundleno = 1018 (0x3fa), region = 56  ;;  %p328_p10 = scmp.lt.s32.totalorder (!%p292_p9), %s1407_s23, 63  ;;  %1545 = vmatprep.subr.bf16.mxu0 (!%p292_p9), %v1703_v0  ;;  %v1706_v51 = vld [vmem:[%s2190_s3] sm:$0xff] (!%p292_p9)   ;;  %v1707_v52 = vld [vmem:[%s2190_s3 + $0x8] ss:$0 sps:$4 sm:$0xff] (!%p292_p9)   ;;  %vm691_vm2 = vcmask (!%p292_p9), 195584  }
   0xf   : > { %1546 = vmatpush3.bf16.msra.mxu0 (!%p292_p9), %v1703_v0  ;;  %1583 = vmatprep.subr.bf16.mxu1 (!%p292_p9), %v1706_v51  ;;  %v742_v53 = vsel (!%p292_p9), %vm740_vm1, %v1707_v52, 0  ;;  %v1708_v54 = vld [vmem:[%s2192_s5] sm:$0xff] (!%p292_p9)   ;;  %vm968_vm3 = vcmask (!%p292_p9), 130048   ;;  %vm1233_vm4 = vcmask (!%p292_p9), 97280   ;;  %s324_s24 = sand.u32 (!%p292_p9), 1, %s1763_s10   ;;  %s1472_s26 = sshll.u32 (!%p292_p9), %s1846_s13, 8 }
  0x10   : > { %1547 = vmatprep.subr.bf16.mxu0 (!%p292_p9), %v1704_v1  ;;  %1584 = vmatpush3.bf16.msra.mxu1 (!%p292_p9), %v1706_v51  ;;  %v1948_v55 = vld [vmem:[%s2189_s2] ss:$0 sm:$0xff] (!%p292_p9)  ;;  %s1406_s25 = sshll.u32 (!%p292_p9), %s324_s24, 4  ;;  %s1329_s13 = scalar_lea.sflag (!%p292_p9), [#allocation3], %s324_s24 }
  0x11   : > { %1653 = vmatprep.subr.msk.bf16.mxu1 (!%p292_p9), %vm740_vm1, %v1707_v52  ;;  %s326_s27 = scalar_lea.vmem (!%p292_p9), [#allocation2], %s1406_s25  ;;  %s1774_s21 = smov (!%p292_p9), [#allocation2]  }
  0x12   : > { %s1713_s22 = sshll.u32 (!%p292_p9), %s1774_s21, 4  ;;  %s1714_s22 = int_to_ptr.vmem [resolvable:$false] %s1713_s22 }
  0x13   : > { %1548 = vmatpush3.bf16.msra.mxu0 (!%p292_p9), %v1704_v1 }
  0x14   : > { %1549 = vmatprep.subr.bf16.mxu0 (!%p292_p9), %v1705_v2  ;;  %1586 = vmatpush3.bf16.msra.mxu1 (!%p292_p9), %v742_v53 }
  0x15   : > { %s2204_s23 = smov (!%p328_p10, %s1407_s23), 63  ;;  %1619 = vmatprep.subr.bf16.mxu1 %v1708_v54 }
  0x16   : > { %s1408_s28 = sshll.u32 %s2204_s23, 3  ;;  %s1715_s23 = scalar_lea.vmem %s1714_s22, 512 }
  0x17   : > { %s1886_s16 = scalar_lea.vmem %s2187_s0, %s1408_s28  ;;  %1550 = vmatpush3.bf16.msra.mxu0 %v1705_v2  ;;  %s1343_s28 = sshll.u32 %s326_s27, 4  ;;  %s2147_s28 = int_to_ptr.vmem [resolvable:$true] %s1343_s28 }
  0x18   : > { %v335_v3 = vld [vmem:[%s1886_s16] sm:$0xff]  ;;  %v336_v4 = vld [vmem:[%s1886_s16 + $0x8] sm:$0xff]  ;;  %v337_v5 = vld [vmem:[%s1886_s16 + $0x10] sm:$0xff]  ;;  %s1709_s17 = scalar_lea.vmem %s2147_s28, 256  ;;  %p1716_p0 = scmp.lt.s32.totalorder %s2147_s28, %s1714_s22 }
  0x19   : > { %v367_v6 = vpack.c.bf16 %v336_v4, %v335_v3  ;;  %v338_v7 = vld [vmem:[%s1886_s16 + $0x18] sm:$0xff]  ;;  %v339_v8 = vld [vmem:[%s1886_s16 + $0x20] sm:$0xff]  ;;  %v340_v9 = vld [vmem:[%s1886_s16 + $0x28] sm:$0xff]  ;;  %p1710_p11 = scmp.ne.s32.totalorder %s2147_s28, %s1709_s17  ;;  %p1717_p1 = scmp.lt.s32.totalorder %s1715_s23, %s1709_s17 }
  0x1a   : > { %v368_v10 = vpack.c.bf16 %v338_v7, %v337_v5  ;;  %v369_v11 = vpack.c.bf16 %v340_v9, %v339_v8  ;;  %v341_v12 = vld [vmem:[%s1886_s16 + $0x30] sm:$0xff]  ;;  %v342_v13 = vld [vmem:[%s1886_s16 + $0x38] sm:$0xff]  ;;  %v343_v14 = vld [vmem:[%s1886_s16 + $0x40] sm:$0xff] }
  0x1b   : > { %1551 = vmatprep.mubr.msk.bf16.mxu0 %vm414_vm0, %v367_v6  ;;  %v344_v15 = vld [vmem:[%s1886_s16 + $0x48] sm:$0xff]  ;;  %v370_v16 = vpack.c.bf16 %v342_v13, %v341_v12  ;;  %v345_v18 = vld [vmem:[%s1886_s16 + $0x50] sm:$0xff]  ;;  %v346_v19 = vld [vmem:[%s1886_s16 + $0x58] sm:$0xff]  ;;  %p1711_p12 = pnand %p1710_p11, %p1863_p5  ;;  %p1718_p2 = por %p1717_p1, %p1716_p0 }
  0x1c   : > { %1552 = vmatmul.mubr.msk.bf16.vlgmr.msra.gmra.mrb[0].mxu0 %vm414_vm0, %v368_v10  ;;  %v371_v17 = vpack.c.bf16 %v344_v15, %v343_v14  ;;  %v347_v20 = vld [vmem:[%s1886_s16 + $0x60] sm:$0xff]  ;;  %v348_v21 = vld [vmem:[%s1886_s16 + $0x68] sm:$0xff]  ;;  %v372_v22 = vpack.c.bf16 %v346_v19, %v345_v18  ;;  %v349_v24 = vld [vmem:[%s1886_s16 + $0x70] sm:$0xff] }
  0x1d   : > { %1555 = vmatprep.mubr.msk.bf16.mxu0 %vm414_vm0, %v369_v11  ;;  %v373_v23 = vpack.c.bf16 %v348_v21, %v347_v20  ;;  %v350_v25 = vld [vmem:[%s1886_s16 + $0x78] sm:$0xff]  ;;  %v351_v26 = vld [vmem:[%s1886_s16 + $0x80] sm:$0xff]  ;;  %v352_v27 = vld [vmem:[%s1886_s16 + $0x88] sm:$0xff]  ;;  %p1712_p13 = pneg %p1711_p12 }
  0x1e   : > { %v374_v28 = vpack.c.bf16 %v350_v25, %v349_v24  ;;  %v375_v29 = vpack.c.bf16 %v352_v27, %v351_v26  ;;  %v353_v30 = vld [vmem:[%s1886_s16 + $0x90] sm:$0xff]  ;;  %v354_v31 = vld [vmem:[%s1886_s16 + $0x98] sm:$0xff]  ;;  %v355_v32 = vld [vmem:[%s1886_s16 + $0xa0] sm:$0xff] }
  0x1f   : > { %v356_v33 = vld [vmem:[%s1886_s16 + $0xa8] sm:$0xff]  ;;  %v376_v34 = vpack.c.bf16 %v354_v31, %v353_v30  ;;  %v357_v36 = vld [vmem:[%s1886_s16 + $0xb0] sm:$0xff]  ;;  %v358_v37 = vld [vmem:[%s1886_s16 + $0xb8] sm:$0xff]  ;;  %p1719_p3 = pnand %p1718_p2, %p1712_p13 }
  0x20   : > { %v377_v35 = vpack.c.bf16 %v356_v33, %v355_v32  ;;  %v359_v38 = vld [vmem:[%s1886_s16 + $0xc0] sm:$0xff]  ;;  %v360_v39 = vld [vmem:[%s1886_s16 + $0xc8] sm:$0xff]  ;;  %v378_v40 = vpack.c.bf16 %v358_v37, %v357_v36  ;;  %v361_v42 = vld [vmem:[%s1886_s16 + $0xd0] sm:$0xff] }
  0x21   : > { %v379_v41 = vpack.c.bf16 %v360_v39, %v359_v38  ;;  %v362_v43 = vld [vmem:[%s1886_s16 + $0xd8] sm:$0xff]  ;;  %v363_v44 = vld [vmem:[%s1886_s16 + $0xe0] sm:$0xff]  ;;  %v364_v45 = vld [vmem:[%s1886_s16 + $0xe8] sm:$0xff] }
  0x22   : > { %v380_v46 = vpack.c.bf16 %v362_v43, %v361_v42  ;;  %v381_v47 = vpack.c.bf16 %v364_v45, %v363_v44  ;;  %v365_v48 = vld [vmem:[%s1886_s16 + $0xf0] sm:$0xff]  ;;  %v366_v49 = vld [vmem:[%s1886_s16 + $0xf8] sm:$0xff]  ;;  %s2145_s16 = scalar_lea.hbm %s2196_s9, %s1472_s26 }
  0x23   : > { %v382_v50 = vpack.c.bf16 %v366_v49, %v365_v48 }
  0x24   : > { %1556 = vmatmul.mubr.msk.bf16.gmra.mrb[4].mxu0 %vm414_vm0, %v370_v16 }
  0x25   : > { %1559 = vmatprep.mubr.msk.bf16.mxu0 %vm414_vm0, %v371_v17 }
  0x2c   : > { %1560 = vmatmul.mubr.msk.bf16.gmra.mrb[8].mxu0 %vm414_vm0, %v372_v22 }
  0x2d   : > { %1563 = vmatprep.mubr.msk.bf16.mxu0 %vm414_vm0, %v373_v23 }
  0x34   : > { %1564 = vmatmul.mubr.msk.bf16.gmra.mrb[12].mxu0 %vm414_vm0, %v374_v28 }
  0x35   : > { %1567 = vmatprep.mubr.msk.bf16.mxu0 %vm414_vm0, %v375_v29 }
  0x3c   : > { %1568 = vmatmul.mubr.msk.bf16.gmra.mrb[16].mxu0 %vm414_vm0, %v376_v34 }
  0x3d   : > { %1571 = vmatprep.mubr.msk.bf16.mxu0 %vm414_vm0, %v377_v35 }
  0x44   : > { %1572 = vmatmul.mubr.msk.bf16.gmra.mrb[20].mxu0 %vm414_vm0, %v378_v40 }
  0x45   : > { %1575 = vmatprep.mubr.msk.bf16.mxu0 %vm414_vm0, %v379_v41 }
  0x4c   : > { %1576 = vmatmul.mubr.msk.bf16.gmra.mrb[24].mxu0 %vm414_vm0, %v380_v46 }
  0x4d   : > { %1579 = vmatprep.mubr.msk.bf16.mxu0 %vm414_vm0, %v381_v47 }
  0x54   : > { %1580 = vmatmul.mubr.msk.bf16.gmra.mrb[28].mxu0 %vm414_vm0, %v382_v50 }
  0xef   : > { %v1553_v56 = vpop.f32.mrb[0].mxu0 }
  0xf0   : > { %v506_v57 = vadd.f32 %v1553_v56, %v1948_v55  ;;  %v497_v58 = vpop.f32.mrb[1].mxu0 }
  0xf1   : > { %v498_v59 = vadd.f32 %v1948_v55, %v497_v58  ;;  %v1554_v60 = vpop.f32.mrb[2].mxu0 }
  0xf2   : > { %v509_v61 = vadd.f32 %v1554_v60, %v1948_v55  ;;  %v500_v62 = vpop.f32.mrb[3].mxu0  ;;  %v626_v0 = vmax.f32 %v506_v57, 0.0 }
  0xf3   : > { %v501_v63 = vadd.f32 %v1948_v55, %v500_v62  ;;  %v624_v2 = vmax.f32 %v498_v59, 0.0 }
  0xf4   : > { %v627_v1 = vmax.f32 %v509_v61, 0.0 }
  0xf5   : > { %v625_v3 = vmax.f32 %v501_v63, 0.0 }
  0xf6   : > { %v657_v4 = vpack.c.bf16 %v627_v1, %v626_v0 }
  0xf7   : > { %v1557_v5 = vpop.f32.mrb[4].mxu0  ;;  %v656_v6 = vpack.c.bf16 %v625_v3, %v624_v2 }
  0xf8   : > { %v522_v7 = vadd.f32 %v1557_v5, %v1948_v55  ;;  %v513_v8 = vpop.f32.mrb[5].mxu0 }
  0xf9   : > { %v514_v9 = vadd.f32 %v1948_v55, %v513_v8  ;;  %v1558_v10 = vpop.f32.mrb[6].mxu0  ;;  %1587 = vmatprep.mubr.msk.bf16.mxu1 %vm691_vm2, %v656_v6 }
  0xfa   : > { %v525_v11 = vadd.f32 %v1558_v10, %v1948_v55  ;;  %v516_v12 = vpop.f32.mrb[7].mxu0  ;;  %1588 = vmatmul.mubr.msk.bf16.vlgmr.msra.gmra.mrb[0].mxu1 %vm691_vm2, %v657_v4  ;;  %v630_v14 = vmax.f32 %v522_v7, 0.0 }
  0xfb   : > { %v517_v13 = vadd.f32 %v1948_v55, %v516_v12  ;;  %1620 = vmatpush3.bf16.msra.mxu1 %v1708_v54  ;;  %v628_v16 = vmax.f32 %v514_v9, 0.0 }
  0xfc   : > { %v631_v15 = vmax.f32 %v525_v11, 0.0 }
  0xfd   : > { %v629_v17 = vmax.f32 %v517_v13, 0.0 }
  0xfe   : > { %v659_v18 = vpack.c.bf16 %v631_v15, %v630_v14 }
  0xff   : > { %v658_v19 = vpack.c.bf16 %v629_v17, %v628_v16  ;;  %v1561_v20 = vpop.f32.mrb[8].mxu0 }
 0x100   : > { %v538_v21 = vadd.f32 %v1561_v20, %v1948_v55  ;;  %v529_v22 = vpop.f32.mrb[9].mxu0 }
 0x101   : > { %v530_v23 = vadd.f32 %v1948_v55, %v529_v22  ;;  %v1562_v24 = vpop.f32.mrb[10].mxu0  ;;  %1591 = vmatprep.mubr.msk.bf16.mxu1 %vm691_vm2, %v658_v19 }
 0x102   : > { %v541_v25 = vadd.f32 %v1562_v24, %v1948_v55  ;;  %v532_v26 = vpop.f32.mrb[11].mxu0  ;;  %1592 = vmatmul.mubr.msk.bf16.gmra.mrb[4].mxu1 %vm691_vm2, %v659_v18  ;;  %v634_v28 = vmax.f32 %v538_v21, 0.0 }
 0x103   : > { %v533_v27 = vadd.f32 %v1948_v55, %v532_v26  ;;  %v632_v30 = vmax.f32 %v530_v23, 0.0 }
 0x104   : > { %v635_v29 = vmax.f32 %v541_v25, 0.0 }
 0x105   : > { %v633_v31 = vmax.f32 %v533_v27, 0.0 }
 0x106   : > { %v661_v32 = vpack.c.bf16 %v635_v29, %v634_v28 }
 0x107   : > { %v660_v33 = vpack.c.bf16 %v633_v31, %v632_v30  ;;  %v1565_v34 = vpop.f32.mrb[12].mxu0 }
 0x108   : > { %v554_v35 = vadd.f32 %v1565_v34, %v1948_v55  ;;  %v545_v36 = vpop.f32.mrb[13].mxu0 }
 0x109   : > { %v546_v37 = vadd.f32 %v1948_v55, %v545_v36  ;;  %v1566_v38 = vpop.f32.mrb[14].mxu0  ;;  %1595 = vmatprep.mubr.msk.bf16.mxu1 %vm691_vm2, %v660_v33 }
 0x10a   : > { %v557_v39 = vadd.f32 %v1566_v38, %v1948_v55  ;;  %v548_v40 = vpop.f32.mrb[15].mxu0  ;;  %1596 = vmatmul.mubr.msk.bf16.gmra.mrb[8].mxu1 %vm691_vm2, %v661_v32  ;;  %v638_v42 = vmax.f32 %v554_v35, 0.0 }
 0x10b   : > { %v549_v41 = vadd.f32 %v1948_v55, %v548_v40  ;;  %v636_v44 = vmax.f32 %v546_v37, 0.0 }
 0x10c   : > { %v639_v43 = vmax.f32 %v557_v39, 0.0 }
 0x10d   : > { %v637_v45 = vmax.f32 %v549_v41, 0.0  ;;  %v2001_v41 = vld [vmem:[%s2191_s4] ss:$0 sm:$0xff] }
 0x10e   : > { %v663_v46 = vpack.c.bf16 %v639_v43, %v638_v42 }
 0x10f   : > { %v662_v47 = vpack.c.bf16 %v637_v45, %v636_v44  ;;  %v1569_v48 = vpop.f32.mrb[16].mxu0 }
 0x110   : > { %v570_v49 = vadd.f32 %v1569_v48, %v1948_v55  ;;  %v561_v50 = vpop.f32.mrb[17].mxu0 }
 0x111   : > { %v562_v51 = vadd.f32 %v1948_v55, %v561_v50  ;;  %v1570_v52 = vpop.f32.mrb[18].mxu0  ;;  %1599 = vmatprep.mubr.msk.bf16.mxu1 %vm691_vm2, %v662_v47 }
 0x112   : > { %v573_v53 = vadd.f32 %v1570_v52, %v1948_v55  ;;  %v564_v54 = vpop.f32.mrb[19].mxu0  ;;  %1600 = vmatmul.mubr.msk.bf16.gmra.mrb[12].mxu1 %vm691_vm2, %v663_v46  ;;  %v642_v57 = vmax.f32 %v570_v49, 0.0 }
 0x113   : > { %v565_v56 = vadd.f32 %v1948_v55, %v564_v54  ;;  %v640_v59 = vmax.f32 %v562_v51, 0.0 }
 0x114   : > { %v643_v58 = vmax.f32 %v573_v53, 0.0 }
 0x115   : > { %v641_v60 = vmax.f32 %v565_v56, 0.0 }
 0x116   : > { %v665_v61 = vpack.c.bf16 %v643_v58, %v642_v57 }
 0x117   : > { %v664_v62 = vpack.c.bf16 %v641_v60, %v640_v59  ;;  %v1573_v63 = vpop.f32.mrb[20].mxu0 }
 0x118   : > { %v586_v0 = vadd.f32 %v1573_v63, %v1948_v55  ;;  %v577_v1 = vpop.f32.mrb[21].mxu0 }
 0x119   : > { %v578_v2 = vadd.f32 %v1948_v55, %v577_v1  ;;  %v1574_v3 = vpop.f32.mrb[22].mxu0  ;;  %1603 = vmatprep.mubr.msk.bf16.mxu1 %vm691_vm2, %v664_v62 }
 0x11a   : > { %v646_v4 = vmax.f32 %v586_v0, 0.0  ;;  %v589_v5 = vadd.f32 %v1574_v3, %v1948_v55  ;;  %v580_v6 = vpop.f32.mrb[23].mxu0  ;;  %1604 = vmatmul.mubr.msk.bf16.gmra.mrb[16].mxu1 %vm691_vm2, %v665_v61 }
 0x11b   : > { %v644_v7 = vmax.f32 %v578_v2, 0.0  ;;  %v581_v8 = vadd.f32 %v1948_v55, %v580_v6 }
 0x11c   : > { %v647_v9 = vmax.f32 %v589_v5, 0.0 }
 0x11d   : > { %v645_v10 = vmax.f32 %v581_v8, 0.0 }
 0x11e   : > { %v667_v11 = vpack.c.bf16 %v647_v9, %v646_v4 }
 0x11f   : > { %v666_v12 = vpack.c.bf16 %v645_v10, %v644_v7  ;;  %v1577_v13 = vpop.f32.mrb[24].mxu0 }
 0x120   : > { %v602_v14 = vadd.f32 %v1577_v13, %v1948_v55  ;;  %v593_v15 = vpop.f32.mrb[25].mxu0 }
 0x121   : > { %1607 = vmatprep.mubr.msk.bf16.mxu1 %vm691_vm2, %v666_v12  ;;  %v594_v16 = vadd.f32 %v1948_v55, %v593_v15  ;;  %v1578_v17 = vpop.f32.mrb[26].mxu0 }
 0x122   : > { %1608 = vmatmul.mubr.msk.bf16.gmra.mrb[20].mxu1 %vm691_vm2, %v667_v11  ;;  %v650_v18 = vmax.f32 %v602_v14, 0.0  ;;  %v605_v19 = vadd.f32 %v1578_v17, %v1948_v55  ;;  %v596_v20 = vpop.f32.mrb[27].mxu0 }
 0x123   : > { %v648_v21 = vmax.f32 %v594_v16, 0.0  ;;  %v597_v22 = vadd.f32 %v1948_v55, %v596_v20 }
 0x124   : > { %v651_v23 = vmax.f32 %v605_v19, 0.0 }
 0x125   : > { %v649_v24 = vmax.f32 %v597_v22, 0.0 }
 0x126   : > { %v669_v25 = vpack.c.bf16 %v651_v23, %v650_v18 }
 0x127   : > { %v668_v26 = vpack.c.bf16 %v649_v24, %v648_v21  ;;  %v1581_v27 = vpop.f32.mrb[28].mxu0 }
 0x128   : > { %v618_v28 = vadd.f32 %v1581_v27, %v1948_v55  ;;  %v609_v29 = vpop.f32.mrb[29].mxu0 }
 0x129   : > { %1611 = vmatprep.mubr.msk.bf16.mxu1 %vm691_vm2, %v668_v26  ;;  %v610_v30 = vadd.f32 %v1948_v55, %v609_v29  ;;  %v1582_v31 = vpop.f32.mrb[30].mxu0 }
 0x12a   : > { %1612 = vmatmul.mubr.msk.bf16.gmra.mrb[24].mxu1 %vm691_vm2, %v669_v25  ;;  %v654_v32 = vmax.f32 %v618_v28, 0.0  ;;  %v621_v33 = vadd.f32 %v1582_v31, %v1948_v55  ;;  %v612_v34 = vpop.f32.mrb[31].mxu0 }
 0x12b   : > { %v652_v35 = vmax.f32 %v610_v30, 0.0  ;;  %v613_v36 = vadd.f32 %v1948_v55, %v612_v34 }
 0x12c   : > { %v655_v37 = vmax.f32 %v621_v33, 0.0 }
 0x12d   : > { %v653_v38 = vmax.f32 %v613_v36, 0.0 }
 0x12e   : > { %v671_v39 = vpack.c.bf16 %v655_v37, %v654_v32 }
 0x12f   : > { %v670_v40 = vpack.c.bf16 %v653_v38, %v652_v35 }
 0x131   : > { %1615 = vmatprep.mubr.msk.bf16.mxu1 %vm691_vm2, %v670_v40 }
 0x132   : > { %1616 = vmatmul.mubr.msk.bf16.gmra.mrb[28].mxu1 %vm691_vm2, %v671_v39 }
 0x1cd   : > { %v1589_v42 = vpop.f32.mrb[0].mxu1 }
 0x1ce   : > { %v787_v43 = vadd.f32 %v1589_v42, %v2001_v41  ;;  %v778_v44 = vpop.f32.mrb[1].mxu1 }
 0x1cf   : > { %v779_v45 = vadd.f32 %v2001_v41, %v778_v44  ;;  %v1590_v55 = vpop.f32.mrb[2].mxu1 }
 0x1d0   : > { %v790_v46 = vadd.f32 %v1590_v55, %v2001_v41  ;;  %v781_v47 = vpop.f32.mrb[3].mxu1  ;;  %v907_v49 = vmax.f32 %v787_v43, 0.0 }
 0x1d1   : > { %v782_v48 = vadd.f32 %v2001_v41, %v781_v47  ;;  %v905_v51 = vmax.f32 %v779_v45, 0.0 }
 0x1d2   : > { %v908_v50 = vmax.f32 %v790_v46, 0.0 }
 0x1d3   : > { %v906_v52 = vmax.f32 %v782_v48, 0.0 }
 0x1d4   : > { %v938_v53 = vpack.c.bf16 %v908_v50, %v907_v49 }
 0x1d5   : > { %v937_v54 = vpack.c.bf16 %v906_v52, %v905_v51  ;;  %v1593_v56 = vpop.f32.mrb[4].mxu1 }
 0x1d6   : > { %v803_v57 = vadd.f32 %v1593_v56, %v2001_v41  ;;  %v794_v58 = vpop.f32.mrb[5].mxu1 }
 0x1d7   : > { %v795_v59 = vadd.f32 %v2001_v41, %v794_v58  ;;  %v1594_v60 = vpop.f32.mrb[6].mxu1  ;;  %1621 = vmatprep.mubr.msk.bf16.mxu1 %vm968_vm3, %v937_v54 }
 0x1d8   : > { %v806_v61 = vadd.f32 %v1594_v60, %v2001_v41  ;;  %v797_v62 = vpop.f32.mrb[7].mxu1  ;;  %1622 = vmatmul.mubr.msk.bf16.vlgmr.msra.gmra.mrb[32].mxu1 %vm968_vm3, %v938_v53  ;;  %v911_v0 = vmax.f32 %v803_v57, 0.0 }
 0x1d9   : > { %v798_v63 = vadd.f32 %v2001_v41, %v797_v62  ;;  %v909_v2 = vmax.f32 %v795_v59, 0.0 }
 0x1da   : > { %v912_v1 = vmax.f32 %v806_v61, 0.0 }
 0x1db   : > { %v910_v3 = vmax.f32 %v798_v63, 0.0 }
 0x1dc   : > { %v940_v4 = vpack.c.bf16 %v912_v1, %v911_v0 }
 0x1dd   : > { %v939_v5 = vpack.c.bf16 %v910_v3, %v909_v2  ;;  %v1597_v6 = vpop.f32.mrb[8].mxu1 }
 0x1de   : > { %v819_v7 = vadd.f32 %v1597_v6, %v2001_v41  ;;  %v810_v8 = vpop.f32.mrb[9].mxu1 }
 0x1df   : > { %v811_v9 = vadd.f32 %v2001_v41, %v810_v8  ;;  %v1598_v10 = vpop.f32.mrb[10].mxu1  ;;  %1625 = vmatprep.mubr.msk.bf16.mxu1 %vm968_vm3, %v939_v5 }
 0x1e0   : > { %v822_v11 = vadd.f32 %v1598_v10, %v2001_v41  ;;  %v813_v12 = vpop.f32.mrb[11].mxu1  ;;  %1626 = vmatmul.mubr.msk.bf16.gmra.mrb[36].mxu1 %vm968_vm3, %v940_v4  ;;  %v915_v14 = vmax.f32 %v819_v7, 0.0 }
 0x1e1   : > { %v814_v13 = vadd.f32 %v2001_v41, %v813_v12  ;;  %v913_v16 = vmax.f32 %v811_v9, 0.0 }
 0x1e2   : > { %v916_v15 = vmax.f32 %v822_v11, 0.0 }
 0x1e3   : > { %v914_v17 = vmax.f32 %v814_v13, 0.0 }
 0x1e4   : > { %v942_v18 = vpack.c.bf16 %v916_v15, %v915_v14 }
 0x1e5   : > { %v941_v19 = vpack.c.bf16 %v914_v17, %v913_v16  ;;  %v1601_v20 = vpop.f32.mrb[12].mxu1 }
 0x1e6   : > { %v835_v21 = vadd.f32 %v1601_v20, %v2001_v41  ;;  %v826_v22 = vpop.f32.mrb[13].mxu1 }
 0x1e7   : > { %v827_v23 = vadd.f32 %v2001_v41, %v826_v22  ;;  %v1602_v24 = vpop.f32.mrb[14].mxu1  ;;  %1629 = vmatprep.mubr.msk.bf16.mxu1 %vm968_vm3, %v941_v19 }
 0x1e8   : > { %v838_v25 = vadd.f32 %v1602_v24, %v2001_v41  ;;  %v829_v26 = vpop.f32.mrb[15].mxu1  ;;  %1630 = vmatmul.mubr.msk.bf16.gmra.mrb[40].mxu1 %vm968_vm3, %v942_v18  ;;  %v919_v28 = vmax.f32 %v835_v21, 0.0 }
 0x1e9   : > { %v830_v27 = vadd.f32 %v2001_v41, %v829_v26  ;;  %v917_v30 = vmax.f32 %v827_v23, 0.0 }
 0x1ea   : > { %v920_v29 = vmax.f32 %v838_v25, 0.0 }
 0x1eb   : > { %v918_v31 = vmax.f32 %v830_v27, 0.0  ;;  %v2054_v27 = vld [vmem:[%s2194_s7] sm:$0xf] }
 0x1ec   : > { %v944_v32 = vpack.c.bf16 %v920_v29, %v919_v28  ;;  %1543 = vmatprep.mubr.msk.bf16.mxu0 %vm1233_vm4, %v2054_v27  ;;  %v1773_v28 = vmov 0   ;;  %v2064_v29 = vld [vmem:[%s2193_s6] ss:$0 sm:$0xff] }
 0x1ed   : > { %v943_v33 = vpack.c.bf16 %v918_v31, %v917_v30  ;;  %v1605_v34 = vpop.f32.mrb[16].mxu1  ;;  %1702 = vset.pattern.permute.xlu0 %v1773_v28 }
 0x1ee   : > { %v851_v35 = vadd.f32 %v1605_v34, %v2001_v41  ;;  %v842_v36 = vpop.f32.mrb[17].mxu1 }
 0x1ef   : > { %v843_v37 = vadd.f32 %v2001_v41, %v842_v36  ;;  %v1606_v38 = vpop.f32.mrb[18].mxu1  ;;  %1633 = vmatprep.mubr.msk.bf16.mxu1 %vm968_vm3, %v943_v33 }
 0x1f0   : > { %v854_v39 = vadd.f32 %v1606_v38, %v2001_v41  ;;  %v845_v40 = vpop.f32.mrb[19].mxu1  ;;  %1634 = vmatmul.mubr.msk.bf16.gmra.mrb[44].mxu1 %vm968_vm3, %v944_v32  ;;  %v923_v43 = vmax.f32 %v851_v35, 0.0 }
 0x1f1   : > { %v846_v42 = vadd.f32 %v2001_v41, %v845_v40  ;;  %v921_v45 = vmax.f32 %v843_v37, 0.0 }
 0x1f2   : > { %v924_v44 = vmax.f32 %v854_v39, 0.0 }
 0x1f3   : > { %v922_v55 = vmax.f32 %v846_v42, 0.0 }
 0x1f4   : > { %v946_v46 = vpack.c.bf16 %v924_v44, %v923_v43 }
 0x1f5   : > { %v945_v47 = vpack.c.bf16 %v922_v55, %v921_v45  ;;  %v1609_v48 = vpop.f32.mrb[20].mxu1 }
 0x1f6   : > { %v867_v49 = vadd.f32 %v1609_v48, %v2001_v41  ;;  %v858_v50 = vpop.f32.mrb[21].mxu1 }
 0x1f7   : > { %v859_v51 = vadd.f32 %v2001_v41, %v858_v50  ;;  %v1610_v52 = vpop.f32.mrb[22].mxu1  ;;  %1637 = vmatprep.mubr.msk.bf16.mxu1 %vm968_vm3, %v945_v47 }
 0x1f8   : > { %v927_v53 = vmax.f32 %v867_v49, 0.0  ;;  %v870_v54 = vadd.f32 %v1610_v52, %v2001_v41  ;;  %v861_v56 = vpop.f32.mrb[23].mxu1  ;;  %1638 = vmatmul.mubr.msk.bf16.gmra.mrb[48].mxu1 %vm968_vm3, %v946_v46 }
 0x1f9   : > { %v925_v57 = vmax.f32 %v859_v51, 0.0  ;;  %v862_v58 = vadd.f32 %v2001_v41, %v861_v56 }
 0x1fa   : > { %v928_v59 = vmax.f32 %v870_v54, 0.0 }
 0x1fb   : > { %v926_v60 = vmax.f32 %v862_v58, 0.0 }
 0x1fc   : > { %v948_v61 = vpack.c.bf16 %v928_v59, %v927_v53 }
 0x1fd   : > { %v947_v62 = vpack.c.bf16 %v926_v60, %v925_v57  ;;  %v1613_v63 = vpop.f32.mrb[24].mxu1 }
 0x1fe   : > { %v883_v0 = vadd.f32 %v1613_v63, %v2001_v41  ;;  %v874_v1 = vpop.f32.mrb[25].mxu1 }
 0x1ff   : > { %1641 = vmatprep.mubr.msk.bf16.mxu1 %vm968_vm3, %v947_v62  ;;  %v875_v2 = vadd.f32 %v2001_v41, %v874_v1  ;;  %v1614_v3 = vpop.f32.mrb[26].mxu1 }
 0x200   : > { %1642 = vmatmul.mubr.msk.bf16.gmra.mrb[52].mxu1 %vm968_vm3, %v948_v61  ;;  %v931_v4 = vmax.f32 %v883_v0, 0.0  ;;  %v886_v5 = vadd.f32 %v1614_v3, %v2001_v41  ;;  %v877_v6 = vpop.f32.mrb[27].mxu1 }
 0x201   : > { %v929_v7 = vmax.f32 %v875_v2, 0.0  ;;  %v878_v8 = vadd.f32 %v2001_v41, %v877_v6 }
 0x202   : > { %v932_v9 = vmax.f32 %v886_v5, 0.0 }
 0x203   : > { %v930_v10 = vmax.f32 %v878_v8, 0.0 }
 0x204   : > { %v950_v11 = vpack.c.bf16 %v932_v9, %v931_v4 }
 0x205   : > { %v949_v12 = vpack.c.bf16 %v930_v10, %v929_v7  ;;  %v1617_v13 = vpop.f32.mrb[28].mxu1 }
 0x206   : > { %v899_v14 = vadd.f32 %v1617_v13, %v2001_v41  ;;  %v890_v15 = vpop.f32.mrb[29].mxu1 }
 0x207   : > { %1645 = vmatprep.mubr.msk.bf16.mxu1 %vm968_vm3, %v949_v12  ;;  %v891_v16 = vadd.f32 %v2001_v41, %v890_v15  ;;  %v1618_v17 = vpop.f32.mrb[30].mxu1 }
 0x208   : > { %1646 = vmatmul.mubr.msk.bf16.gmra.mrb[56].mxu1 %vm968_vm3, %v950_v11  ;;  %v935_v18 = vmax.f32 %v899_v14, 0.0  ;;  %v902_v19 = vadd.f32 %v1618_v17, %v2001_v41  ;;  %v893_v20 = vpop.f32.mrb[31].mxu1 }
 0x209   : > { %v933_v21 = vmax.f32 %v891_v16, 0.0  ;;  %v894_v22 = vadd.f32 %v2001_v41, %v893_v20  ;;  %v1227_v41 = vld [vmem:[%s2195_s8] sm:$0xff] }
 0x20a   : > { %v936_v23 = vmax.f32 %v902_v19, 0.0  ;;  %1230 = vperm.xlu0 %1702, %v1227_v41  }
 0x20b   : > { %v934_v24 = vmax.f32 %v894_v22, 0.0 }
 0x20c   : > { %v952_v25 = vpack.c.bf16 %v936_v23, %v935_v18 }
 0x20d   : > { %v951_v26 = vpack.c.bf16 %v934_v24, %v933_v21 }
 0x20f   : > { %1649 = vmatprep.mubr.msk.bf16.mxu1 %vm968_vm3, %v951_v26 }
 0x210   : > { %1650 = vmatmul.mubr.msk.bf16.gmra.mrb[60].mxu1 %vm968_vm3, %v952_v25 }
 0x2ab   : > { %v1623_v30 = vpop.f32.mrb[32].mxu1 }
 0x2ac   : > { %v1060_v31 = vadd.f32 %v1623_v30, %v2064_v29  ;;  %v1051_v32 = vpop.f32.mrb[33].mxu1 }
 0x2ad   : > { %v1052_v33 = vadd.f32 %v2064_v29, %v1051_v32  ;;  %v1624_v34 = vpop.f32.mrb[34].mxu1 }
 0x2ae   : > { %v1063_v35 = vadd.f32 %v1624_v34, %v2064_v29  ;;  %v1054_v36 = vpop.f32.mrb[35].mxu1  ;;  %v1180_v38 = vmax.f32 %v1060_v31, 0.0 }
 0x2af   : > { %v1055_v37 = vadd.f32 %v2064_v29, %v1054_v36  ;;  %v1178_v40 = vmax.f32 %v1052_v33, 0.0 }
 0x2b0   : > { %v1181_v39 = vmax.f32 %v1063_v35, 0.0 }
 0x2b1   : > { %v1179_v42 = vmax.f32 %v1055_v37, 0.0 }
 0x2b2   : > { %v2070_v43 = vpack.c.bf16 %v1181_v39, %v1180_v38 }
 0x2b3   : > { %v2072_v44 = vpack.c.bf16 %v1179_v42, %v1178_v40  ;;  %v1627_v45 = vpop.f32.mrb[36].mxu1 }
 0x2b4   : > { %v1076_v55 = vadd.f32 %v1627_v45, %v2064_v29  ;;  %v1067_v46 = vpop.f32.mrb[37].mxu1 }
 0x2b5   : > { %v1068_v47 = vadd.f32 %v2064_v29, %v1067_v46  ;;  %v1628_v48 = vpop.f32.mrb[38].mxu1 }
 0x2b6   : > { %v1079_v49 = vadd.f32 %v1628_v48, %v2064_v29  ;;  %v1070_v50 = vpop.f32.mrb[39].mxu1  ;;  %v1184_v52 = vmax.f32 %v1076_v55, 0.0  ;;  %v1238_v55 = vsel %vm1233_vm4, %v2072_v44, 0  ;;  %v1241_v44 = vsel %vm1233_vm4, %v2070_v43, 0 }
 0x2b7   : > { %v1071_v51 = vadd.f32 %v2064_v29, %v1070_v50  ;;  %v1182_v54 = vmax.f32 %v1068_v47, 0.0 }
 0x2b8   : > { %v1185_v53 = vmax.f32 %v1079_v49, 0.0 }
 0x2b9   : > { %v1183_v56 = vmax.f32 %v1071_v51, 0.0 }
 0x2ba   : > { %v2078_v57 = vpack.c.bf16 %v1185_v53, %v1184_v52 }
 0x2bb   : > { %v2080_v58 = vpack.c.bf16 %v1183_v56, %v1182_v54  ;;  %v1631_v59 = vpop.f32.mrb[40].mxu1 }
 0x2bc   : > { %v1092_v60 = vadd.f32 %v1631_v59, %v2064_v29  ;;  %v1083_v61 = vpop.f32.mrb[41].mxu1 }
 0x2bd   : > { %v1084_v62 = vadd.f32 %v2064_v29, %v1083_v61  ;;  %v1632_v63 = vpop.f32.mrb[42].mxu1 }
 0x2be   : > { %v1095_v0 = vadd.f32 %v1632_v63, %v2064_v29  ;;  %v1086_v1 = vpop.f32.mrb[43].mxu1  ;;  %v1188_v3 = vmax.f32 %v1092_v60, 0.0 }
 0x2bf   : > { %v1087_v2 = vadd.f32 %v2064_v29, %v1086_v1  ;;  %v1186_v5 = vmax.f32 %v1084_v62, 0.0 }
 0x2c0   : > { %v1189_v4 = vmax.f32 %v1095_v0, 0.0 }
 0x2c1   : > { %v1187_v6 = vmax.f32 %v1087_v2, 0.0 }
 0x2c2   : > { %v2086_v7 = vpack.c.bf16 %v1189_v4, %v1188_v3 }
 0x2c3   : > { %v2088_v8 = vpack.c.bf16 %v1187_v6, %v1186_v5  ;;  %v1635_v9 = vpop.f32.mrb[44].mxu1 }
 0x2c4   : > { %v1108_v10 = vadd.f32 %v1635_v9, %v2064_v29  ;;  %v1099_v11 = vpop.f32.mrb[45].mxu1 }
 0x2c5   : > { %v1100_v12 = vadd.f32 %v2064_v29, %v1099_v11  ;;  %v1636_v13 = vpop.f32.mrb[46].mxu1 }
 0x2c6   : > { %v1111_v14 = vadd.f32 %v1636_v13, %v2064_v29  ;;  %v1102_v15 = vpop.f32.mrb[47].mxu1  ;;  %v1192_v17 = vmax.f32 %v1108_v10, 0.0 }
 0x2c7   : > { %v1103_v16 = vadd.f32 %v2064_v29, %v1102_v15  ;;  %v1190_v19 = vmax.f32 %v1100_v12, 0.0  ;;  %v1244_v12 = vsel %vm1233_vm4, %v2080_v58, 0  ;;  %v1247_v58 = vsel %vm1233_vm4, %v2078_v57, 0 }
 0x2c8   : > { %v1193_v18 = vmax.f32 %v1111_v14, 0.0 }
 0x2c9   : > { %v1191_v20 = vmax.f32 %v1103_v16, 0.0 }
 0x2ca   : > { %v2094_v21 = vpack.c.bf16 %v1193_v18, %v1192_v17 }
 0x2cb   : > { %v2096_v22 = vpack.c.bf16 %v1191_v20, %v1190_v19  ;;  %v1639_v23 = vpop.f32.mrb[48].mxu1 }
 0x2cc   : > { %v1124_v24 = vadd.f32 %v1639_v23, %v2064_v29  ;;  %v1115_v25 = vpop.f32.mrb[49].mxu1  ;;  %v1259_v57 = vsel %vm1233_vm4, %v2094_v21, 0 }
 0x2cd   : > { %v1116_v26 = vadd.f32 %v2064_v29, %v1115_v25  ;;  %v1640_v41 = vpop.f32.mrb[50].mxu1 }
 0x2ce   : > { %v1127_v28 = vadd.f32 %v1640_v41, %v2064_v29  ;;  %v1118_v30 = vpop.f32.mrb[51].mxu1  ;;  %v1196_v32 = vmax.f32 %v1124_v24, 0.0  ;;  %v1256_v41 = vsel %vm1233_vm4, %v2096_v22, 0 }
 0x2cf   : > { %v1119_v31 = vadd.f32 %v2064_v29, %v1118_v30  ;;  %v1194_v34 = vmax.f32 %v1116_v26, 0.0  ;;  %v1250_v26 = vsel %vm1233_vm4, %v2088_v8, 0  ;;  %v1231_v8 = vpop.permute.xlu0 %1230 }
 0x2d0   : > { %v1197_v33 = vmax.f32 %v1127_v28, 0.0 }
 0x2d1   : > { %v1195_v35 = vmax.f32 %v1119_v31, 0.0 }
 0x2d2   : > { %v1219_v36 = vpack.c.bf16 %v1197_v33, %v1196_v32 }
 0x2d3   : > { %v1218_v37 = vpack.c.bf16 %v1195_v35, %v1194_v34  ;;  %v1643_v38 = vpop.f32.mrb[52].mxu1 }
 0x2d4   : > { %v1140_v39 = vadd.f32 %v1643_v38, %v2064_v29  ;;  %v1131_v40 = vpop.f32.mrb[53].mxu1 }
 0x2d5   : > { %v1132_v42 = vadd.f32 %v2064_v29, %v1131_v40  ;;  %v1644_v45 = vpop.f32.mrb[54].mxu1  ;;  %1654 = vmatprep.subr.msk.bf16.mxu0 %vm1233_vm4, %v1218_v37 }
 0x2d6   : > { %v1143_v46 = vadd.f32 %v1644_v45, %v2064_v29  ;;  %v1134_v47 = vpop.f32.mrb[55].mxu1  ;;  %1528 = vmatpush3.bf16.xpose.msra.mxu0 %v1238_v55  ;;  %v1200_v49 = vmax.f32 %v1140_v39, 0.0 }
 0x2d7   : > { %v1135_v48 = vadd.f32 %v2064_v29, %v1134_v47  ;;  %1655 = vmatprep.subr.msk.bf16.mxu0 %vm1233_vm4, %v1219_v36  ;;  %v1198_v51 = vmax.f32 %v1132_v42, 0.0 }
 0x2d8   : > { %v1201_v50 = vmax.f32 %v1143_v46, 0.0 }
 0x2d9   : > { %v1199_v52 = vmax.f32 %v1135_v48, 0.0 }
 0x2da   : > { %v1221_v53 = vpack.c.bf16 %v1201_v50, %v1200_v49 }
 0x2db   : > { %v1220_v54 = vpack.c.bf16 %v1199_v52, %v1198_v51  ;;  %v1647_v56 = vpop.f32.mrb[56].mxu1 }
 0x2dc   : > { %v1156_v59 = vadd.f32 %v1647_v56, %v2064_v29  ;;  %v1147_v60 = vpop.f32.mrb[57].mxu1 }
 0x2dd   : > { %v1148_v61 = vadd.f32 %v2064_v29, %v1147_v60  ;;  %v1648_v62 = vpop.f32.mrb[58].mxu1 }
 0x2de   : > { %1530 = vmatpush3.bf16.xpose.msra.mxu0 %v1241_v44  ;;  %v1204_v63 = vmax.f32 %v1156_v59, 0.0  ;;  %v1159_v0 = vadd.f32 %v1648_v62, %v2064_v29  ;;  %v1150_v1 = vpop.f32.mrb[59].mxu1 }
 0x2df   : > { %1656 = vmatprep.subr.msk.bf16.mxu0 %vm1233_vm4, %v1220_v54  ;;  %v1202_v2 = vmax.f32 %v1148_v61, 0.0  ;;  %v1151_v3 = vadd.f32 %v2064_v29, %v1150_v1 }
 0x2e0   : > { %v1205_v4 = vmax.f32 %v1159_v0, 0.0 }
 0x2e1   : > { %v1203_v5 = vmax.f32 %v1151_v3, 0.0 }
 0x2e2   : > { %v1223_v6 = vpack.c.bf16 %v1205_v4, %v1204_v63 }
 0x2e3   : > { %v1222_v9 = vpack.c.bf16 %v1203_v5, %v1202_v2  ;;  %v1651_v10 = vpop.f32.mrb[60].mxu1 }
 0x2e4   : > { %v1172_v43 = vadd.f32 %v1651_v10, %v2064_v29  ;;  %v1163_v11 = vpop.f32.mrb[61].mxu1 }
 0x2e5   : > { %v1164_v13 = vadd.f32 %v2064_v29, %v1163_v11  ;;  %v1652_v14 = vpop.f32.mrb[62].mxu1 }
 0x2e6   : > { %1532 = vmatpush3.bf16.xpose.msra.mxu0 %v1244_v12  ;;  %v1208_v15 = vmax.f32 %v1172_v43, 0.0  ;;  %v1175_v16 = vadd.f32 %v1652_v14, %v2064_v29  ;;  %v1166_v17 = vpop.f32.mrb[63].mxu1 }
 0x2e7   : > { %1657 = vmatprep.subr.msk.bf16.mxu0 %vm1233_vm4, %v1221_v53  ;;  %v1206_v18 = vmax.f32 %v1164_v13, 0.0  ;;  %v1167_v19 = vadd.f32 %v2064_v29, %v1166_v17  ;;  %v1253_v29 = vsel %vm1233_vm4, %v2086_v7, 0 }
 0x2e8   : > { %v1209_v20 = vmax.f32 %v1175_v16, 0.0 }
 0x2e9   : > { %v1207_v23 = vmax.f32 %v1167_v19, 0.0 }
 0x2ea   : > { %v1225_v24 = vpack.c.bf16 %v1209_v20, %v1208_v15 }
 0x2eb   : > { %v1224_v25 = vpack.c.bf16 %v1207_v23, %v1206_v18 }
 0x2ee   : > { %1534 = vmatpush3.bf16.xpose.msra.mxu0 %v1247_v58 }
 0x2ef   : > { %1658 = vmatprep.subr.msk.bf16.mxu0 %vm1233_vm4, %v1222_v9 }
 0x2f6   : > { %1536 = vmatpush3.bf16.xpose.msra.mxu0 %v1250_v26 }
 0x2f7   : > { %1659 = vmatprep.subr.msk.bf16.mxu0 %vm1233_vm4, %v1223_v6 }
 0x2fe   : > { %1538 = vmatpush3.bf16.xpose.msra.mxu0 %v1253_v29 }
 0x2ff   : > { %1660 = vmatprep.subr.msk.bf16.mxu0 %vm1233_vm4, %v1224_v25 }
 0x306   : > { %1540 = vmatpush3.bf16.xpose.msra.mxu0 %v1256_v41 }
 0x307   : > { %1661 = vmatprep.subr.msk.bf16.mxu0 %vm1233_vm4, %v1225_v24 }
 0x30e   : > { %1542 = vmatpush3.bf16.xpose.msra.mxu0 %v1259_v57 }
 0x315   : > { %1544 = vmatmul.mubr.msk.bf16.vlgmr.msra.gmra.mrb[32].mxu0 %vm1233_vm4, %v2054_v27 }
 0x3e8   : > { %v1319_v7 = vpop.f32.mrb[32].mxu0 }
 0x3e9   : > { %v1320_v28 = vadd.f32 %v1319_v7, %v1231_v8  ;;  %v1321_v22 = vpop.f32.mrb[33].mxu0 }
 0x3ea   : > { %v1322_v30 = vadd.f32 %v1321_v22, %v1231_v8  ;;  %v1323_v31 = vpop.f32.mrb[34].mxu0 }
 0x3eb   : > { %1326 = vst [vmem:[%s326_s27] sm:$0xff] %v1320_v28  ;;  %v1324_v27 = vpop.f32.mrb[35].mxu0 }
 0x3ec   : > { %1327 = vst [vmem:[%s326_s27 + $0x8] sm:$0xff] %v1322_v30 }
 0x3ed   : > { %1722 = shalt.err (!%p1719_p3)
}
 0x3ee   : > { %s1723_s24 = scalar_lea.hbm %s2145_s16, 256  ;;  %s1727_s27 = scalar_lea.hbm %s2196_s9, 512 }
 0x3ef   : > { %p1724_p4 = scmp.ne.s32.totalorder %s2145_s16, %s1723_s24  ;;  %p1728_p9 = scmp.lt.u32.totalorder %s2145_s16, %s2196_s9 }
 0x3f0   : > { %p1729_p10 = scmp.lt.u32.totalorder %s1727_s27, %s1723_s24  ;;  %p1731_p12 = scmp.lt.u32.totalorder %s1723_s24, %s2145_s16 }
 0x3f1   : > { %p1725_p7 = pnand %p1724_p4, %p1863_p5 }
 0x3f2   : > { %p1730_p11 = por %p1729_p10, %p1728_p9 }
 0x3f3   : > { %p1726_p8 = pneg %p1725_p7 }
 0x3f4   : > { %p1732_p13 = por %p1731_p12, %p1730_p11 }
 0x3f6   : > { %p1733_p0 = pnand %p1732_p13, %p1726_p8 }
 0x3f8   : > { %1736 = shalt.err (!%p1733_p0)
}
 0x3f9   : > { %1662 = dma.vmem_to_hbm [thread:$0]  (%p1863_p5), %s2147_s28, 256, %s2145_s16, %s1329_s13  }
 0x3fa PF: > { %p1668_p1 = scmp.ge.s32.totalorder %s1771_s12, 2  ;;  %s1355_s17 = sand.u32 1, %s1759_s30  }
 0x3fb   : > { %s1356_s21 = scalar_lea.sflag [#allocation3], %s1355_s17 }
 0x3fc   : > { %p1665_p2 = pnand %p1668_p1, %p1867_p6 }
 0x3fe   : > { %1754 = dma.done.wait (!%p1665_p2), %s1356_s21, 256  }
 0x3ff   : > { %1756 = vsyncadd (!%p1665_p2), %s1356_s21, 4294967040  ;;  %p19_p3 = scmp.ge.s32.totalorder %s1850_s15, 4   ;;  %s2199_s30 = smov %s1763_s10 }
 0x400   : > { %s2200_s10 = smov %s1767_s11  ;;  %s2201_s11 = smov %s1861_s18 }
 0x401   : > { %s2202_s12 = smov %s1850_s15  ;;  %21 = sbr.rel (!%p19_p3) target bundleno = 3 (0x3), region = 91 }
 0x408   :  { %1361 = vsyncpa [#allocation3], 1 }
 0x409   :  { %1363 = vsyncpa [#allocation3 + $0x1], 1 }

</bundles_post_ra>
